<compile_context>
chip_gen: v7x
topology: tpu7x:2x2x1
jax: 0.10.0
libtpu: 0.0.40
codegen_flags: <defaults>
</compile_context>

<pallas_src>
import functools

import jax
import jax.numpy as jnp
from jax.experimental import pallas as pl
from jax.experimental.pallas import tpu as pltpu

LANES = 128
HIDDEN = 10  # fixed by the module definition (nn.Linear(s_dim, 10))


def _round_up(n, m):
    return (n + m - 1) // m * m


def _cdiv(a, b):
    return -(-a // b)


def _choose_batch_tiling(B, block_b):
    """Pick (tile_b, padded_B): multiple-of-8 tiles, even step count for v7x."""
    b8 = _round_up(B, 8)
    if b8 <= 16:                       # tiny batch: one block, splitting only adds step overhead
        return b8, b8
    # >= 2 and an even number of grid steps so the "parallel" batch axis splits
    # evenly across v7x's two TensorCores (no one-step load imbalance).
    nsteps = max(2, 2 * _cdiv(b8, 2 * block_b))
    tb = _round_up(_cdiv(b8, nsteps), 8)
    return tb, tb * nsteps


def _make_kernel(k1, a_dim):
    b1_row = k1 + LANES
    b2_row = k1 + LANES + 1

    def kernel(x_ref, w_ref, o_ref):
        x = x_ref[...]                                    # [TB, K1]
        w1 = w_ref[0:k1, :]                               # [K1, 128]  trunk weights
        w2 = w_ref[k1:k1 + LANES, :]                      # [128, 128] head weights
        b1 = w_ref[b1_row:b1_row + 1, :]                  # [1, 128]   trunk bias
        b2 = w_ref[b2_row:b2_row + 1, :]                  # [1, 128]   head bias

        # Fused actor/critic trunk: cols [0,H)=a1, [H,2H)=c1, rest exactly 0.
        trunk = jnp.dot(x, w1, preferred_element_type=jnp.float32) + b1
        trunk = jnp.clip(trunk, 0.0, 6.0)                 # relu6

        # Fused mu/sigma/value heads in one MXU push:
        # cols [0,A)=mu_lin, [A,2A)=sigma_lin, col 2A=value, rest 0.
        second = jnp.dot(trunk, w2, preferred_element_type=jnp.float32) + b2

        col = jax.lax.broadcasted_iota(jnp.int32, second.shape, 1)
        mu = 2.0 * jnp.tanh(second)
        # Stable softplus core; the +0.001 floor is added post-upcast in the
        # wrapper so it survives a bf16 output slab.
        softplus = jnp.maximum(second, 0.0) + jnp.log1p(jnp.exp(-jnp.abs(second)))
        # TODO(synk): if v7x profiling shows the EUP slot binding, share one exp
        # between tanh and softplus (E=exp(-|s|), tanh=(1-E^2)/(1+E^2) + sign fixup).
        res = jnp.where(col < a_dim, mu,
                        jnp.where(col < 2 * a_dim, softplus, second))
        o_ref[...] = res.astype(o_ref.dtype)

    return kernel


def pack_params(params, s_dim, a_dim, hidden=HIDDEN):
    """Pack the 10 Linear params into one lane-dense [RW, 128] f32 slab.

    Call ONCE per parameter update and reuse the slab across forward calls.
    NOTE: weights are expected as [in, out]; PyTorch nn.Linear stores [out, in],
    so transpose when importing a real checkpoint.
    """
    (wa1, ba1, wmu, bmu, wsig, bsig, wc1, bc1, wv, bv) = params
    assert 2 * hidden <= LANES and 2 * a_dim + 1 <= LANES
    k1 = _round_up(s_dim, 8)

    w1 = jnp.zeros((k1, LANES), jnp.float32)
    w1 = w1.at[:s_dim, 0:hidden].set(wa1)
    w1 = w1.at[:s_dim, hidden:2 * hidden].set(wc1)

    w2 = jnp.zeros((LANES, LANES), jnp.float32)
    w2 = w2.at[0:hidden, 0:a_dim].set(wmu)
    w2 = w2.at[0:hidden, a_dim:2 * a_dim].set(wsig)
    w2 = w2.at[hidden:2 * hidden, 2 * a_dim:2 * a_dim + 1].set(wv)

    b1 = jnp.zeros((1, LANES), jnp.float32)
    b1 = b1.at[:, 0:hidden].set(ba1.reshape(1, -1))
    b1 = b1.at[:, hidden:2 * hidden].set(bc1.reshape(1, -1))

    b2 = jnp.zeros((1, LANES), jnp.float32)
    b2 = b2.at[:, 0:a_dim].set(bmu.reshape(1, -1))
    b2 = b2.at[:, a_dim:2 * a_dim].set(bsig.reshape(1, -1))
    b2 = b2.at[:, 2 * a_dim:2 * a_dim + 1].set(bv.reshape(1, -1))

    slab = jnp.concatenate([w1, w2, b1, b2], axis=0)      # [k1 + 130, 128]
    rw = _round_up(slab.shape[0], 8)
    if rw != slab.shape[0]:
        slab = jnp.pad(slab, ((0, rw - slab.shape[0]), (0, 0)))
    return slab


@functools.partial(jax.jit, static_argnames=("a_dim", "block_b", "out_dtype"))
def net_forward_packed(x, w_slab, *, a_dim, block_b=4096, out_dtype=jnp.float32):
    """Net.forward from a pre-packed weight slab. Returns (mu, sigma, values)."""
    B, s_dim = x.shape
    k1 = _round_up(s_dim, 8)
    rw = w_slab.shape[0]
    tb, b_pad = _choose_batch_tiling(B, block_b)

    x = x.astype(jnp.float32)
    if b_pad != B or k1 != s_dim:
        # Single pad op; skipped when batch/features are already aligned.
        x = jnp.pad(x, ((0, b_pad - B), (0, k1 - s_dim)))

    cost = pl.CostEstimate(
        flops=2 * b_pad * (k1 + LANES) * LANES,
        transcendentals=3 * b_pad * LANES,
        bytes_accessed=(b_pad * (k1 + LANES) + rw * LANES) * 4,
    )

    out = pl.pallas_call(
        _make_kernel(k1, a_dim),
        out_shape=jax.ShapeDtypeStruct((b_pad, LANES), out_dtype),
        grid=(b_pad // tb,),
        in_specs=[
            pl.BlockSpec((tb, k1), lambda i: (i, 0)),     # stream x over batch
            # Constant block index -> the pipeline skips the re-copy; the slab
            # (~72 KiB) is DMA'd once and stays resident across all steps.
            pl.BlockSpec((rw, LANES), lambda i: (0, 0)),
        ],
        out_specs=pl.BlockSpec((tb, LANES), lambda i: (i, 0)),
        compiler_params=pltpu.CompilerParams(
            dimension_semantics=("parallel",)),           # megacore split on v7x
        cost_estimate=cost,
    )(x, w_slab)

    mu = out[:B, 0:a_dim]
    # +0.001 applied after upcast so the floor is preserved even for a bf16 slab.
    sigma = out[:B, a_dim:2 * a_dim].astype(jnp.float32) + 0.001
    values = out[:B, 2 * a_dim:2 * a_dim + 1]
    return mu, sigma, values


def net_forward(x, params, *, a_dim, hidden=HIDDEN, block_b=4096,
                out_dtype=jnp.float32):
    """Convenience path: packs params every call. For repeated forwards, call
    pack_params() once and use net_forward_packed() directly (as in __main__)."""
    s_dim = x.shape[1]
    w_slab = pack_params(params, s_dim, a_dim, hidden)
    return net_forward_packed(x, w_slab, a_dim=a_dim, block_b=block_b,
                              out_dtype=out_dtype)


def init_params(key, s_dim, a_dim, hidden=HIDDEN):
    """set_init-style init: weights ~ N(0, 0.1), biases = 0. Stored as [in, out]."""
    ks = jax.random.split(key, 5)

    def lin(k, fin, fout):
        w = 0.1 * jax.random.normal(k, (fin, fout), dtype=jnp.float32)
        b = jnp.zeros((1, fout), dtype=jnp.float32)
        return w, b

    wa1, ba1 = lin(ks[0], s_dim, hidden)
    wmu, bmu = lin(ks[1], hidden, a_dim)
    wsig, bsig = lin(ks[2], hidden, a_dim)
    wc1, bc1 = lin(ks[3], s_dim, hidden)
    wv, bv = lin(ks[4], hidden, 1)
    return (wa1, ba1, wmu, bmu, wsig, bsig, wc1, bc1, wv, bv)


def net_forward_ref(x, params):
    """Pure-JAX reference (matches PyTorch Net.forward)."""
    (wa1, ba1, wmu, bmu, wsig, bsig, wc1, bc1, wv, bv) = params
    a1 = jnp.clip(x @ wa1 + ba1, 0.0, 6.0)
    mu = 2.0 * jnp.tanh(a1 @ wmu + bmu)
    sigma = jax.nn.softplus(a1 @ wsig + bsig) + 0.001
    c1 = jnp.clip(x @ wc1 + bc1, 0.0, 6.0)
    values = c1 @ wv + bv
    return mu, sigma, values


# TODO(synk): choose_action / loss_func (MultivariateNormal sampling, log_prob)
# are not part of Net.forward and are left to host-side jax.random / distrax.

if __name__ == "__main__":
    B, S_DIM, A_DIM = 2, 4, 2

    key = jax.random.PRNGKey(0)
    k_x, k_p, k_x2 = jax.random.split(key, 3)
    x = jax.random.normal(k_x, (B, S_DIM), dtype=jnp.float32)
    params = init_params(k_p, S_DIM, A_DIM, hidden=HIDDEN)

    # Pack once per parameter update, reuse across forward calls.
    w_slab = pack_params(params, S_DIM, A_DIM, hidden=HIDDEN)

    # Small batch (single-block path).
    mu, sigma, values = net_forward_packed(x, w_slab, a_dim=A_DIM)
    jax.block_until_ready((mu, sigma, values))

    mu_r, sigma_r, values_r = net_forward_ref(x, params)
    assert mu.shape == (B, A_DIM) and sigma.shape == (B, A_DIM)
    assert values.shape == (B, 1)
    assert jnp.allclose(mu, mu_r, atol=1e-5, rtol=1e-5)
    assert jnp.allclose(sigma, sigma_r, atol=1e-5, rtol=1e-5)
    assert jnp.allclose(values, values_r, atol=1e-5, rtol=1e-5)

    # Larger batch: exercises padding + the 2-step "parallel" grid (megacore).
    x_big = jax.random.normal(k_x2, (300, S_DIM), dtype=jnp.float32)
    mu_b, sigma_b, values_b = net_forward_packed(x_big, w_slab, a_dim=A_DIM)
    jax.block_until_ready((mu_b, sigma_b, values_b))
    mu_br, sigma_br, values_br = net_forward_ref(x_big, params)
    assert mu_b.shape == (300, A_DIM) and values_b.shape == (300, 1)
    assert jnp.allclose(mu_b, mu_br, atol=1e-5, rtol=1e-5)
    assert jnp.allclose(sigma_b, sigma_br, atol=1e-5, rtol=1e-5)
    assert jnp.allclose(values_b, values_br, atol=1e-5, rtol=1e-5)

    print("KERNEL_OK")
</pallas_src>

<mosaic_0001>
module attributes {stable_mosaic.version = 11 : i64} {
  func.func @kernel(%arg0: i32, %arg1: memref<8x8xf32, #tpu.memory_space<vmem>>, %arg2: memref<144x128xf32, #tpu.memory_space<vmem>>, %arg3: memref<8x128xf32, #tpu.memory_space<vmem>>) attributes {dimension_semantics = [#tpu.dimension_semantics<parallel>], iteration_bounds = array<i64: 1>, scalar_prefetch = 0 : i64, scratch_operands = 0 : i64, tpu.core_type = #tpu.core_type<tc>, window_params = [{transform_indices = @transform_0, window_bounds = array<i64: 8, 8>}, {pipeline_mode = #tpu.pipeline_mode<synchronous>, transform_indices = @transform_1, window_bounds = array<i64: 144, 128>}, {transform_indices = @transform_2, window_bounds = array<i64: 8, 128>}]} {
    %c0 = arith.constant 0 : index
    %c0_0 = arith.constant 0 : index
    %0 = vector.load %arg1[%c0, %c0_0] : memref<8x8xf32, #tpu.memory_space<vmem>>, vector<8x8xf32>
    %c0_1 = arith.constant 0 : index
    %c0_2 = arith.constant 0 : index
    %1 = vector.load %arg2[%c0_1, %c0_2] : memref<144x128xf32, #tpu.memory_space<vmem>>, vector<8x128xf32>
    %c8 = arith.constant 8 : index
    %c0_3 = arith.constant 0 : index
    %2 = vector.load %arg2[%c8, %c0_3] : memref<144x128xf32, #tpu.memory_space<vmem>>, vector<128x128xf32>
    %c136 = arith.constant 136 : index
    %c0_4 = arith.constant 0 : index
    %3 = vector.load %arg2[%c136, %c0_4] : memref<144x128xf32, #tpu.memory_space<vmem>>, vector<1x128xf32>
    %c137 = arith.constant 137 : index
    %c0_5 = arith.constant 0 : index
    %4 = vector.load %arg2[%c137, %c0_5] : memref<144x128xf32, #tpu.memory_space<vmem>>, vector<1x128xf32>
    %cst = arith.constant dense<0.000000e+00> : vector<8x128xf32>
    %5 = tpu.matmul %0, %1, %cst {dimension_numbers = #tpu.dot_dimension_numbers<[1], [0], [0], [1], [0, 0, 1, 1], [], []>} : vector<8x8xf32>, vector<8x128xf32>, vector<8x128xf32> -> vector<8x128xf32>
    %6 = vector.broadcast %3 : vector<1x128xf32> to vector<8x128xf32>
    %7 = arith.addf %5, %6 : vector<8x128xf32>
    %cst_6 = arith.constant 0.000000e+00 : f32
    %cst_7 = arith.constant 6.000000e+00 : f32
    %8 = vector.broadcast %cst_6 : f32 to vector<8x128xf32>
    %9 = arith.maximumf %8, %7 : vector<8x128xf32>
    %10 = vector.broadcast %cst_7 : f32 to vector<8x128xf32>
    %11 = arith.minimumf %10, %9 : vector<8x128xf32>
    %cst_8 = arith.constant dense<0.000000e+00> : vector<8x128xf32>
    %12 = tpu.matmul %11, %2, %cst_8 {dimension_numbers = #tpu.dot_dimension_numbers<[1], [0], [0], [1], [0, 0, 1, 1], [], []>} : vector<8x128xf32>, vector<128x128xf32>, vector<8x128xf32> -> vector<8x128xf32>
    %13 = vector.broadcast %4 : vector<1x128xf32> to vector<8x128xf32>
    %14 = arith.addf %12, %13 : vector<8x128xf32>
    %15 = tpu.iota {dimensions = array<i32: 1>} : vector<8x128xi32>
    %16 = math.tanh %14 : vector<8x128xf32>
    %cst_9 = arith.constant 2.000000e+00 : f32
    %17 = vector.broadcast %cst_9 : f32 to vector<8x128xf32>
    %18 = arith.mulf %17, %16 : vector<8x128xf32>
    %cst_10 = arith.constant 0.000000e+00 : f32
    %19 = vector.broadcast %cst_10 : f32 to vector<8x128xf32>
    %20 = arith.maximumf %14, %19 : vector<8x128xf32>
    %21 = math.absf %14 : vector<8x128xf32>
    %cst_11 = arith.constant 0.000000e+00 : f32
    %22 = vector.broadcast %cst_11 : f32 to vector<8x128xf32>
    %23 = arith.subf %22, %21 : vector<8x128xf32>
    %24 = math.exp %23 : vector<8x128xf32>
    %25 = math.log1p %24 : vector<8x128xf32>
    %26 = arith.addf %20, %25 : vector<8x128xf32>
    %c2_i32 = arith.constant 2 : i32
    %27 = vector.broadcast %c2_i32 : i32 to vector<8x128xi32>
    %28 = arith.cmpi slt, %15, %27 : vector<8x128xi32>
    %c4_i32 = arith.constant 4 : i32
    %29 = vector.broadcast %c4_i32 : i32 to vector<8x128xi32>
    %30 = arith.cmpi slt, %15, %29 : vector<8x128xi32>
    %31 = arith.select %30, %26, %14 : vector<8x128xi1>, vector<8x128xf32>
    %32 = arith.select %28, %18, %31 : vector<8x128xi1>, vector<8x128xf32>
    %c0_12 = arith.constant 0 : index
    %c0_13 = arith.constant 0 : index
    %33 = vector.load %arg3[%c0_12, %c0_13] : memref<8x128xf32, #tpu.memory_space<vmem>>, vector<8x128xf32>
    tpu.vector_store %arg3[%c0_12, %c0_13], %32 {strides = array<i32>} : memref<8x128xf32, #tpu.memory_space<vmem>>, vector<8x128xf32>,
    return
  }
  func.func @transform_0(%arg0: i32) -> (i32, i32) {
    %c0_i32 = arith.constant 0 : i32
    %c0_i32_0 = arith.constant 0 : i32
    return %arg0, %c0_i32 : i32, i32
  }
  func.func @transform_1(%arg0: i32) -> (i32, i32) {
    %c0_i32 = arith.constant 0 : i32
    %c0_i32_0 = arith.constant 0 : i32
    %c0_i32_1 = arith.constant 0 : i32
    return %c0_i32, %c0_i32_0 : i32, i32
  }
  func.func @transform_2(%arg0: i32) -> (i32, i32) {
    %c0_i32 = arith.constant 0 : i32
    %c0_i32_0 = arith.constant 0 : i32
    return %arg0, %c0_i32 : i32, i32
  }
}

</mosaic_0001>

<bundles_post_ra>
// kernel: net_forward_packed.1
= control target key start
LH: loop header
LB: loop body
LE: loop exit
PB: predicated region body
PF: predicated region fallthrough
CT: control target
= control target key end

     0   :  { %7 = vsyncpa [#allocation3], 0  ;;  %s350_s9 = smov [#allocation2]   ;;  %s389_s0 = inlined_call_operand.vmem [shape: f32[8,8], index: 0, kind: input, shape index: {}]   ;;  %s390_s1 = inlined_call_operand.hbm [shape: f32[144,128], index: 1, kind: input, shape index: {}]   ;;  %s391_s2 = inlined_call_operand.vmem [shape: f32[8,128], index: 2, kind: output, shape index: {}]  }
   0x1   :  { %s15_s10 = sshll.u32 %s350_s9, 4  ;;  %s326_s13 = scalar_lea.hbm %s390_s1, 2304  ;;  %s16_s10 = int_to_ptr.vmem [resolvable:$true] %s15_s10 }
   0x2   :  { %p327_p0 = scmp.ne.s32.totalorder %s390_s1, %s326_s13  ;;  %p330_p1 = scmp.lt.u32.totalorder %s326_s13, %s390_s1 }
   0x4   :  { %p332_p2 = pnand %p330_p1, %p327_p0 }
   0x6   :  { %335 = shalt.err (!%p332_p2)
}
   0x7   :  { %s336_s18 = scalar_lea.vmem %s16_s10, 2304  ;;  %p341_p4 = scmp.lt.s32.totalorder %s16_s10, %s16_s10 }
   0x8   :  { %p337_p3 = scmp.ne.s32.totalorder %s16_s10, %s336_s18  ;;  %p342_p5 = scmp.lt.s32.totalorder %s336_s18, %s336_s18 }
   0xa   :  { %p343_p6 = por %p342_p5, %p341_p4 }
   0xc   :  { %p344_p7 = pnand %p343_p6, %p337_p3 }
   0xe   :  { %347 = shalt.err (!%p344_p7)
}
   0xf   :  { %s351_s19 = smov 128   ;;  %s352_s20 = smov 8  }
  0x10   :  { %21 = dma.hbm_to_vmem [thread:$0]  %s390_s1, 2304, %s16_s10, [#allocation3], %s351_s19, %s351_s19, %s352_s20  }
  0x11   :  { %348 = dma.done.wait [#allocation3], 2304  }
  0x12   :  { %349 = vsyncadd [#allocation3], 4294964992  ;;  %v353_v0 = vmov 0.0   ;;  %vm354_vm0 = vmmov 0   ;;  %v355_v1 = vmov 0.0|0.0   ;;  %vm49_vm1 = vcmask 64512  }
  0x13   :  { %250 = vmatprep.subr.mxu0 %v353_v0  ;;  %252 = vmatprep.mubr.msk.f32.mxu0 %vm354_vm0, %v353_v0  ;;  %v26_v2 = vld [vmem:[#allocation2] sm:$0xff]  ;;  %v27_v4 = vld [vmem:[#allocation2 + $0x8] sm:$0xff]  ;;  %v28_v5 = vld [vmem:[#allocation2 + $0x10] sm:$0xff]  ;;  %v199_v44 = vlaneseq }
  0x14   :  { %290 = vmatprep.subr.bf16.mxu1 %v355_v1  ;;  %287 = vmatprep.mubr.msk.f32.mxu1 %vm354_vm0, %v353_v0  ;;  %v25_v3 = vld [vmem:[%s389_s0] sm:$0xff]  ;;  %v29_v6 = vld [vmem:[#allocation2 + $0x18] sm:$0xff]  ;;  %v291_v8 = vpack.c.bf16 %v28_v5, %v27_v4  ;;  %v31_v10 = vld [vmem:[#allocation2 + $0x28] sm:$0xff] }
  0x15   :  { %251 = vmatpush3.msra.mxu0 %v26_v2  ;;  %v30_v7 = vld [vmem:[#allocation2 + $0x20] sm:$0xff]  ;;  %v32_v11 = vld [vmem:[#allocation2 + $0x30] sm:$0xff]  ;;  %v33_v13 = vld [vmem:[#allocation2 + $0x38] sm:$0xff]  ;;  %v200_v47 = vand.u32 127, %v199_v44 }
  0x16   :  { %253 = vmatmul.mubr.msk.f32.vlgmr.msra.gmra.mrb[0].mxu0 %vm49_vm1, %v25_v3  ;;  %292 = vmatpush3.bf16.msra.mxu1 %v291_v8  ;;  %v294_v9 = vpack.c.bf16 %v30_v7, %v29_v6  ;;  %v297_v12 = vpack.c.bf16 %v32_v11, %v31_v10  ;;  %v34_v14 = vld [vmem:[#allocation2 + $0x40] sm:$0xff]  ;;  %v35_v16 = vld [vmem:[#allocation2 + $0x48] sm:$0xff]  ;;  %v36_v17 = vld [vmem:[#allocation2 + $0x50] sm:$0xff] }
  0x17   :  { %293 = vmatprep.subr.bf16.mxu1 %v355_v1  ;;  %v300_v15 = vpack.c.bf16 %v34_v14, %v33_v13  ;;  %v303_v18 = vpack.c.bf16 %v36_v17, %v35_v16  ;;  %v37_v19 = vld [vmem:[#allocation2 + $0x58] sm:$0xff]  ;;  %v38_v20 = vld [vmem:[#allocation2 + $0x60] sm:$0xff]  ;;  %v39_v22 = vld [vmem:[#allocation2 + $0x68] sm:$0xff]  ;;  %vm219_vm3 = vcmp.lt.s32.totalorder %v200_v47, 4  ;;  %vm218_vm4 = vcmp.lt.s32.totalorder %v200_v47, 2 }
  0x18   :  { %v306_v21 = vpack.c.bf16 %v38_v20, %v37_v19  ;;  %v40_v23 = vld [vmem:[#allocation2 + $0x70] sm:$0xff]  ;;  %v41_v25 = vld [vmem:[#allocation2 + $0x78] sm:$0xff]  ;;  %v42_v26 = vld [vmem:[#allocation2 + $0x80] sm:$0xff] }
  0x19   :  { %v309_v24 = vpack.c.bf16 %v40_v23, %v39_v22  ;;  %v312_v27 = vpack.c.bf16 %v42_v26, %v41_v25  ;;  %v228_v28 = vld [vmem:[#allocation2 + $0x88] ss:$0 sm:$0xff]  ;;  %v230_v34 = vld [vmem:[#allocation2 + $0x89] ss:$0 sm:$0xff] }
  0x1a   :  { %295 = vmatpush3.bf16.msra.mxu1 %v294_v9 }
  0x1b   :  { %296 = vmatprep.subr.bf16.mxu1 %v355_v1 }
  0x1e   :  { %298 = vmatpush3.bf16.msra.mxu1 %v297_v12 }
  0x1f   :  { %299 = vmatprep.subr.bf16.mxu1 %v355_v1 }
  0x22   :  { %301 = vmatpush3.bf16.msra.mxu1 %v300_v15 }
  0x23   :  { %302 = vmatprep.subr.bf16.mxu1 %v355_v1 }
  0x26   :  { %304 = vmatpush3.bf16.msra.mxu1 %v303_v18 }
  0x27   :  { %305 = vmatprep.subr.bf16.mxu1 %v355_v1 }
  0x2a   :  { %307 = vmatpush3.bf16.msra.mxu1 %v306_v21 }
  0x2b   :  { %308 = vmatprep.subr.bf16.mxu1 %v355_v1 }
  0x2e   :  { %310 = vmatpush3.bf16.msra.mxu1 %v309_v24 }
  0x2f   :  { %311 = vmatprep.subr.bf16.mxu1 %v355_v1 }
  0x32   :  { %313 = vmatpush3.bf16.msra.mxu1 %v312_v27 }
  0xe9   :  { %v119_v29 = vpop.f32.mrb[0].mxu0 }
  0xea   :  { %v120_v30 = vadd.f32 %v228_v28, %v119_v29  ;;  %v254_v31 = vpop.f32.mrb[1].mxu0 }
  0xec   :  { %v123_v32 = vmax.f32 %v120_v30, 0.0 }
  0xee   :  { %v124_v33 = vmin.f32 %v123_v32, 6.0 }
  0xf0   :  { %288 = vmatmul.mubr.f32.vlgmr.msra.gmra.mrb[0].mxu1 %v124_v33 }
 0x1c3   :  { %v195_v35 = vpop.f32.mrb[0].mxu1 }
 0x1c4   :  { %v196_v36 = vadd.f32 %v230_v34, %v195_v35  ;;  %v289_v37 = vpop.f32.mrb[1].mxu1 }
 0x1c6   :  { %v204_v38 = vand.u32 2147483647, %v196_v36  ;;  %v203_v52 = vmax.f32 %v196_v36, 0.0 }
 0x1c8   :  { %v205_v39 = vsub.f32 0.0, %v204_v38 }
 0x1ca   :  { %v206_v40 = vmul.f32 1.442695, %v205_v39 }
 0x1cc   :  { %320 = vpow2.f32 %v206_v40 }
 0x1d6   :  { %v321_v41 = vpop.eup %320 }
 0x1d7   :  { %v208_v42 = vadd.f32 1.0, %v321_v41  ;;  %v211_v43 = vmul.f32 -0.5, %v321_v41  ;;  %v214_v46 = vand.u32 2147483647, %v321_v41 }
 0x1d9   :  { %322 = vlog2.f32 %v208_v42  ;;  %v212_v45 = vadd.f32 1.0, %v211_v43  ;;  %vm215_vm2 = vcmp.lt.f32.partialorder %v214_v46, 0.0004427343 }
 0x1da   :  { %324 = vtanh.f32 %v196_v36 }
 0x1db   :  { %v213_v50 = vmul.f32 %v321_v41, %v212_v45 }
 0x1e3   :  { %v323_v48 = vpop.eup %322 }
 0x1e4   :  { %v210_v49 = vmul.f32 0.6931472, %v323_v48  ;;  %v325_v51 = vpop.eup %324 }
 0x1e5   :  { %v202_v55 = vmul.f32 2.0, %v325_v51 }
 0x1e6   :  { %v216_v53 = vsel %vm215_vm2, %v213_v50, %v210_v49 }
 0x1e7   :  { %v217_v54 = vadd.f32 %v216_v53, %v203_v52 }
 0x1e9   :  { %v220_v56 = vsel %vm219_vm3, %v217_v54, %v196_v36 }
 0x1ea   :  { %v221_v57 = vsel %vm218_vm4, %v202_v55, %v220_v56 }
 0x1eb   :  { %222 = vst [vmem:[%s391_s2] sm:$0xff] %v221_v57 }
 0x1ec   :  { %227 = vsyncpa [#allocation3], 1 }

</bundles_post_ra>
